<compile_context>
chip_gen: v7x
topology: tpu7x:2x2x1
jax: 0.10.0
libtpu: 0.0.40
codegen_flags: <defaults>
</compile_context>

<pallas_src>
import functools

import jax
import jax.numpy as jnp
from jax.experimental import pallas as pl
from jax.experimental.pallas import tpu as pltpu

LANES = 128
SUBLANES = 8
MAX_BLOCK_ROWS = 1024   # (1024, 128) f32 = 512 KiB per input block
NUM_PARTS = 2           # leading "parallel" axis -> 2 TCs on v7x


def _margin_loss_kernel(x_ref, y_ref, o_ref, acc_ref, *,
                        margin, n_valid, block_rows, blocks_per_part):
    p = pl.program_id(0)
    j = pl.program_id(1)

    @pl.when(j == 0)
    def _():
        acc_ref[...] = jnp.zeros_like(acc_ref)

    xf = x_ref[...].astype(jnp.float32)
    yf = y_ref[...].astype(jnp.float32)
    hinge = jnp.maximum(jnp.abs(xf - yf) - margin, 0.0)

    # Mask everything past the true element count: wrapper tail padding, Pallas
    # edge-block padding, and fully out-of-range partitions all land here.
    # (int32 flat index is fine for any tensor that fits in HBM per-core here.)
    base = (p * blocks_per_part + j) * (block_rows * LANES)
    row_iota = jax.lax.broadcasted_iota(jnp.int32, hinge.shape, 0)
    lane_iota = jax.lax.broadcasted_iota(jnp.int32, hinge.shape, 1)
    flat_idx = base + row_iota * LANES + lane_iota
    hinge = jnp.where(flat_idx < n_valid, hinge, 0.0)

    # vreg-shaped accumulation: (block_rows, 128) -> (block_rows//8, 8, 128)
    # summed over the leading axis = pure VPU adds; the XLU reduce happens only
    # once, in the epilogue below.
    acc_ref[...] += hinge.reshape(-1, SUBLANES, LANES).sum(axis=0)

    @pl.when(j == pl.num_programs(1) - 1)
    def _():
        o_ref[...] = jnp.sum(acc_ref[...]).reshape(1, 1, 1)


def margin_loss(x, y, margin=0.094):
    assert x.shape == y.shape, "x and y must have the same shape"
    n = int(x.size)
    margin = float(margin)

    xf = jnp.ravel(x)   # no wrapper astype: cast happens in-kernel
    yf = jnp.ravel(y)

    # Lane-dense (rows, 128) slab. Only the ragged tail (< 1024 elements) gets
    # zero-padded; padded elements are masked inside the kernel.
    chunk = SUBLANES * LANES
    pad = (-n) % chunk
    if pad:
        xf = jnp.pad(xf, (0, pad))
        yf = jnp.pad(yf, (0, pad))
    rows = (n + pad) // LANES                 # multiple of 8
    x2d = xf.reshape(rows, LANES)
    y2d = yf.reshape(rows, LANES)

    block_rows = min(MAX_BLOCK_ROWS, rows)    # both are multiples of 8
    n_blocks = -(-rows // block_rows)
    blocks_per_part = -(-n_blocks // NUM_PARTS)

    def in_map(p, j):
        # Clamp so out-of-range partitions re-read a valid block; the in-kernel
        # mask zeroes their contribution.
        return (jnp.minimum(p * blocks_per_part + j, n_blocks - 1), 0)

    kernel = functools.partial(
        _margin_loss_kernel,
        margin=margin,                 # plain Python scalars -> jaxpr literals,
        n_valid=n,                     # not captured jnp constants
        block_rows=int(block_rows),
        blocks_per_part=int(blocks_per_part),
    )

    partials = pl.pallas_call(
        kernel,
        out_shape=jax.ShapeDtypeStruct((NUM_PARTS, 1, 1), jnp.float32),
        grid_spec=pltpu.PrefetchScalarGridSpec(
            num_scalar_prefetch=0,
            grid=(NUM_PARTS, blocks_per_part),
            in_specs=[
                pl.BlockSpec((block_rows, LANES), in_map),
                pl.BlockSpec((block_rows, LANES), in_map),
            ],
            out_specs=pl.BlockSpec((1, 1, 1), lambda p, j: (p, 0, 0)),
            scratch_shapes=[pltpu.VMEM((SUBLANES, LANES), jnp.float32)],
        ),
        compiler_params=pltpu.CompilerParams(
            dimension_semantics=("parallel", "arbitrary"),
        ),
    )(x2d, y2d)

    return (jnp.sum(partials) / n).astype(x.dtype)


if __name__ == "__main__":
    key = jax.random.PRNGKey(0)
    kx, ky = jax.random.split(key)
    shape = (2, 4, 16, 16)  # NCHW
    x = jax.random.normal(kx, shape, dtype=jnp.float32)
    y = jax.random.normal(ky, shape, dtype=jnp.float32)

    loss = margin_loss(x, y, margin=0.094)
    jax.block_until_ready(loss)

    # Plain-JAX reference (mirrors the PyTorch module).
    ref = jnp.mean(jnp.maximum(jnp.abs(x - y) - 0.094, 0.0))
    assert jnp.allclose(loss, ref, rtol=1e-5, atol=1e-6), (loss, ref)

    print("KERNEL_OK")
</pallas_src>

<mosaic_0001>
module attributes {stable_mosaic.version = 11 : i64} {
  func.func @_margin_loss_kernel(%arg0: i32, %arg1: i32, %arg2: memref<16x128xf32, #tpu.memory_space<vmem>>, %arg3: memref<16x128xf32, #tpu.memory_space<vmem>>, %arg4: memref<1x1x1xf32, #tpu.memory_space<vmem>>, %arg5: memref<8x128xf32, #tpu.memory_space<vmem>>) attributes {dimension_semantics = [#tpu.dimension_semantics<parallel>, #tpu.dimension_semantics<arbitrary>], iteration_bounds = array<i64: 2, 1>, scalar_prefetch = 0 : i64, scratch_operands = 1 : i64, tpu.core_type = #tpu.core_type<tc>, window_params = [{transform_indices = @transform_0, window_bounds = array<i64: 16, 128>}, {transform_indices = @transform_1, window_bounds = array<i64: 16, 128>}, {transform_indices = @transform_2, window_bounds = array<i64: 1, 1, 1>}]} {
    %c0_i32 = arith.constant 0 : i32
    %0 = arith.cmpi eq, %arg1, %c0_i32 : i32
    %1 = arith.extui %0 : i1 to i32
    %c0_i32_0 = arith.constant 0 : i32
    %2 = arith.cmpi ne, %1, %c0_i32_0 : i32
    scf.if %2 {
      %cst_14 = arith.constant 0.000000e+00 : f32
      %33 = vector.broadcast %cst_14 : f32 to vector<8x128xf32>
      %c0_15 = arith.constant 0 : index
      %c0_16 = arith.constant 0 : index
      %34 = vector.load %arg5[%c0_15, %c0_16] : memref<8x128xf32, #tpu.memory_space<vmem>>, vector<8x128xf32>
      tpu.vector_store %arg5[%c0_15, %c0_16], %33 {strides = array<i32>} : memref<8x128xf32, #tpu.memory_space<vmem>>, vector<8x128xf32>,
    } else {
    }
    %c0 = arith.constant 0 : index
    %c0_1 = arith.constant 0 : index
    %3 = vector.load %arg2[%c0, %c0_1] : memref<16x128xf32, #tpu.memory_space<vmem>>, vector<16x128xf32>
    %c0_2 = arith.constant 0 : index
    %c0_3 = arith.constant 0 : index
    %4 = vector.load %arg3[%c0_2, %c0_3] : memref<16x128xf32, #tpu.memory_space<vmem>>, vector<16x128xf32>
    %5 = arith.subf %3, %4 : vector<16x128xf32>
    %6 = math.absf %5 : vector<16x128xf32>
    %cst = arith.constant 9.400000e-02 : f32
    %7 = vector.broadcast %cst : f32 to vector<16x128xf32>
    %8 = arith.subf %6, %7 : vector<16x128xf32>
    %cst_4 = arith.constant 0.000000e+00 : f32
    %9 = vector.broadcast %cst_4 : f32 to vector<16x128xf32>
    %10 = arith.maximumf %8, %9 : vector<16x128xf32>
    %c1_i32 = arith.constant 1 : i32
    %11 = arith.muli %arg0, %c1_i32 : i32
    %12 = arith.addi %11, %arg1 : i32
    %c2048_i32 = arith.constant 2048 : i32
    %13 = arith.muli %12, %c2048_i32 : i32
    %14 = tpu.iota {dimensions = array<i32: 0>} : vector<16x128xi32>
    %15 = tpu.iota {dimensions = array<i32: 1>} : vector<16x128xi32>
    %c128_i32 = arith.constant 128 : i32
    %16 = vector.broadcast %c128_i32 : i32 to vector<16x128xi32>
    %17 = arith.muli %14, %16 : vector<16x128xi32>
    %18 = vector.broadcast %13 : i32 to vector<16x128xi32>
    %19 = arith.addi %18, %17 : vector<16x128xi32>
    %20 = arith.addi %19, %15 : vector<16x128xi32>
    %c2048_i32_5 = arith.constant 2048 : i32
    %21 = vector.broadcast %c2048_i32_5 : i32 to vector<16x128xi32>
    %22 = arith.cmpi slt, %20, %21 : vector<16x128xi32>
    %cst_6 = arith.constant 0.000000e+00 : f32
    %23 = vector.broadcast %cst_6 : f32 to vector<16x128xf32>
    %24 = arith.select %22, %10, %23 : vector<16x128xi1>, vector<16x128xf32>
    %c0_7 = arith.constant 0 : index
    %c0_8 = arith.constant 0 : index
    %25 = vector.load %arg5[%c0_7, %c0_8] : memref<8x128xf32, #tpu.memory_space<vmem>>, vector<8x128xf32>
    %26 = vector.shape_cast %24 : vector<16x128xf32> to vector<2x8x128xf32>
    %cst_9 = arith.constant dense<0.000000e+00> : vector<8x128xf32>
    %27 = vector.multi_reduction <add>, %26, %cst_9 [0] : vector<2x8x128xf32> to vector<8x128xf32>
    %28 = arith.addf %25, %27 : vector<8x128xf32>
    %c0_10 = arith.constant 0 : index
    %c0_11 = arith.constant 0 : index
    %29 = vector.load %arg5[%c0_10, %c0_11] : memref<8x128xf32, #tpu.memory_space<vmem>>, vector<8x128xf32>
    tpu.vector_store %arg5[%c0_10, %c0_11], %28 {strides = array<i32>} : memref<8x128xf32, #tpu.memory_space<vmem>>, vector<8x128xf32>,
    %c0_i32_12 = arith.constant 0 : i32
    %30 = arith.cmpi eq, %arg1, %c0_i32_12 : i32
    %31 = arith.extui %30 : i1 to i32
    %c0_i32_13 = arith.constant 0 : i32
    %32 = arith.cmpi ne, %31, %c0_i32_13 : i32
    scf.if %32 {
      %c0_14 = arith.constant 0 : index
      %c0_15 = arith.constant 0 : index
      %33 = vector.load %arg5[%c0_14, %c0_15] : memref<8x128xf32, #tpu.memory_space<vmem>>, vector<8x128xf32>
      %34 = vector.shape_cast %33 : vector<8x128xf32> to vector<1x8x128xf32>
      %cst_16 = arith.constant dense<0.000000e+00> : vector<1xf32>
      %35 = vector.multi_reduction <add>, %34, %cst_16 [1, 2] : vector<1x8x128xf32> to vector<1xf32>
      %36 = vector.shape_cast %35 : vector<1xf32> to vector<1x1x1xf32>
      %37 = vector.extract %36[0, 0, 0] : f32 from vector<1x1x1xf32>
      %38 = vector.broadcast %37 : f32 to vector<1x1x1xf32>
      %c0_17 = arith.constant 0 : index
      %c0_18 = arith.constant 0 : index
      %c0_19 = arith.constant 0 : index
      %39 = vector.load %arg4[%c0_17, %c0_18, %c0_19] : memref<1x1x1xf32, #tpu.memory_space<vmem>>, vector<1x1x1xf32>
      tpu.vector_store %arg4[%c0_17, %c0_18, %c0_19], %38 {strides = array<i32>} : memref<1x1x1xf32, #tpu.memory_space<vmem>>, vector<1x1x1xf32>,
    } else {
    }
    return
  }
  func.func @transform_0(%arg0: i32, %arg1: i32) -> (i32, i32) {
    %c1_i32 = arith.constant 1 : i32
    %0 = arith.muli %arg0, %c1_i32 : i32
    %1 = arith.addi %0, %arg1 : i32
    %c0_i32 = arith.constant 0 : i32
    %2 = arith.minsi %1, %c0_i32 : i32
    %c0_i32_0 = arith.constant 0 : i32
    %c0_i32_1 = arith.constant 0 : i32
    return %2, %c0_i32_0 : i32, i32
  }
  func.func @transform_1(%arg0: i32, %arg1: i32) -> (i32, i32) {
    %c1_i32 = arith.constant 1 : i32
    %0 = arith.muli %arg0, %c1_i32 : i32
    %1 = arith.addi %0, %arg1 : i32
    %c0_i32 = arith.constant 0 : i32
    %2 = arith.minsi %1, %c0_i32 : i32
    %c0_i32_0 = arith.constant 0 : i32
    %c0_i32_1 = arith.constant 0 : i32
    return %2, %c0_i32_0 : i32, i32
  }
  func.func @transform_2(%arg0: i32, %arg1: i32) -> (i32, i32, i32) {
    %c0_i32 = arith.constant 0 : i32
    %c0_i32_0 = arith.constant 0 : i32
    %c0_i32_1 = arith.constant 0 : i32
    return %arg0, %c0_i32, %c0_i32_0 : i32, i32, i32
  }
}

</mosaic_0001>

<bundles_post_ra>
// kernel: tpu_custom_call.1
= control target key start
LH: loop header
LB: loop body
LE: loop exit
PB: predicated region body
PF: predicated region fallthrough
CT: control target
= control target key end

     0   :  { %7 = vsyncpa [#allocation4], 0  ;;  %s723_s0 = inlined_call_operand.hbm [shape: f32[16,128], index: 0, kind: input, shape index: {}]   ;;  %s724_s1 = inlined_call_operand.hbm [shape: f32[16,128], index: 1, kind: input, shape index: {}]   ;;  %s725_s2 = inlined_call_operand.vmem [shape: f32[2,1,1], index: 2, kind: output, shape index: {}]  }
   0x1   :  { %9 = vsyncpa [#allocation4 + $0x1], 0 }
   0x2   :  { %10 = vsyncpa [#allocation6], 0 }
   0x3   :  { %12 = vsyncpa [#allocation6 + $0x1], 0  ;;  %s599_s9 = smov 0   ;;  %s601_s10 = smov 0  }
   0x4   :  { %s603_s11 = smov 0   ;;  %s605_s12 = smov 0  }
   0x5   :  { %s607_s13 = smov 0  }
   0x6 LB: > { %s383_s14 = sadd.s32 4294967295, %s578_s13   ;;  %s30_s15 = sadd.s32 1, %s574_s12  ;;  %s578_s13 = sphi %s607_s13, %s18_s13   ;;  %s574_s12 = sphi %s605_s12, %s734_s12   ;;  %s570_s11 = sphi %s603_s11, %s733_s11   ;;  %s566_s10 = sphi %s601_s10, %s713_s10   ;;  %s562_s9 = sphi %s599_s9, %s732_s9  }
   0x7   : > { %p32_p0 = scmp.ge.s32.totalorder %s30_s15, 2  ;;  %p559_p1 = scmp.ne.s32.totalorder %s566_s10, 0 }
   0x8   : > { %p51_p2 = scmp.eq.s32.totalorder %s578_s13, 0  ;;  %p56_p3 = scmp.ne.s32.totalorder %s566_s10, %s562_s9 }
   0x9   : > { %s736_s15 = smov (%p32_p0, %s30_s15), 0  ;;  %p57_p4 = scmp.eq.s32.totalorder %s383_s14, 0 }
   0xa   : > { %p52_p5 = por %p559_p1, %p51_p2  ;;  %p416_p7 = scmp.lt.s32.totalorder %s578_s13, 2 }
   0xb   : > { %p629_p6 = por %p57_p4, %p56_p3  ;;  %s580_s17 = smov [#allocation3]  }
   0xc   : > { %s152_s18 = sshll.u32 %s580_s17, 4  ;;  %p634_p8 = pnand %p416_p7, %p52_p5  ;;  %s153_s18 = int_to_ptr.vmem [resolvable:$true] %s152_s18 }
   0xd   : > { %s727_s16 = scalar_select %p629_p6, 1, 0 }
   0xe   : > { %s467_s22 = scalar_lea.hbm %s723_s0, 256  ;;  %p469_p10 = pneg %p634_p8 }
   0xf   : > { %p468_p9 = scmp.ne.s32.totalorder %s723_s0, %s467_s22  ;;  %p474_p13 = scmp.lt.u32.totalorder %s467_s22, %s467_s22 }
  0x10   : > { %p476_p0 = scmp.lt.u32.totalorder %s467_s22, %s723_s0 }
  0x11   : > { %p470_p11 = pnand %p469_p10, %p468_p9 }
  0x12   : > { %p477_p1 = por %p476_p0, %p474_p13 }
  0x13   : > { %p471_p12 = pneg %p470_p11 }
  0x15   : > { %p478_p2 = pnand %p477_p1, %p471_p12 }
  0x17   : > { %481 = shalt.err (!%p478_p2)
}
  0x18   : > { %s482_s27 = scalar_lea.vmem %s153_s18, 256  ;;  %s489_s28 = scalar_lea.vmem %s153_s18, 512 }
  0x19   : > { %p483_p3 = scmp.ne.s32.totalorder %s153_s18, %s482_s27  ;;  %p490_p7 = scmp.lt.s32.totalorder %s153_s18, %s153_s18 }
  0x1a   : > { %p491_p6 = scmp.lt.s32.totalorder %s489_s28, %s482_s27 }
  0x1b   : > { %p485_p4 = pnand %p483_p3, %p469_p10 }
  0x1c   : > { %p492_p9 = por %p491_p6, %p490_p7 }
  0x1d   : > { %p486_p5 = pneg %p485_p4 }
  0x1f   : > { %p493_p11 = pnand %p492_p9, %p486_p5 }
  0x21   : > { %496 = shalt.err (!%p493_p11)
}
  0x22   : > { %s581_s29 = smov 128   ;;  %s582_s30 = smov 8  }
  0x23   : > { %412 = dma.hbm_to_vmem [thread:$0]  (!%p634_p8), %s723_s0, 256, %s153_s18, [#allocation4], %s581_s29, %s581_s29, %s582_s30  }
  0x24   : > { %p393_p12 = scmp.ge.s32.totalorder %s578_s13, 1  ;;  %p184_p13 = scmp.lt.s32.totalorder %s578_s13, 3 }
  0x25   : > { %s583_s6 = smov [#allocation5]   ;;  %s497_s14 = scalar_lea.hbm %s724_s1, 256 }
  0x26   : > { %p665_p0 = pnand %p393_p12, %p184_p13  ;;  %s176_s7 = sshll.u32 %s583_s6, 4  ;;  %s177_s7 = int_to_ptr.vmem [resolvable:$true] %s176_s7 }
  0x27   : > { %p498_p6 = scmp.ne.s32.totalorder %s724_s1, %s497_s14  ;;  %p504_p3 = scmp.lt.u32.totalorder %s497_s14, %s497_s14 }
  0x28   : > { %s729_s5 = scalar_select %p665_p0, 1, 0 }
  0x29   : > { %p500_p1 = pnand %p498_p6, %p469_p10  ;;  %p506_p4 = scmp.lt.u32.totalorder %s497_s14, %s724_s1 }
  0x2b   : > { %p501_p2 = pneg %p500_p1  ;;  %p507_p5 = por %p506_p4, %p504_p3 }
  0x2d   : > { %p508_p7 = pnand %p507_p5, %p501_p2 }
  0x2f   : > { %511 = shalt.err (!%p508_p7)
}
  0x30   : > { %s512_s22 = scalar_lea.vmem %s177_s7, 256  ;;  %s519_s23 = scalar_lea.vmem %s177_s7, 512 }
  0x31   : > { %p513_p9 = scmp.ne.s32.totalorder %s177_s7, %s512_s22  ;;  %p520_p13 = scmp.lt.s32.totalorder %s177_s7, %s177_s7 }
  0x32   : > { %p521_p0 = scmp.lt.s32.totalorder %s519_s23, %s512_s22 }
  0x33   : > { %p515_p11 = pnand %p513_p9, %p469_p10 }
  0x34   : > { %p522_p6 = por %p521_p0, %p520_p13 }
  0x35   : > { %p516_p12 = pneg %p515_p11 }
  0x37   : > { %p523_p1 = pnand %p522_p6, %p516_p12 }
  0x39   : > { %526 = shalt.err (!%p523_p1)
}
  0x3a   : > { %415 = dma.hbm_to_vmem [thread:$0]  (!%p634_p8), %s724_s1, 256, %s177_s7, [#allocation6], %s581_s29, %s581_s29, %s582_s30  }
  0x3b   : > { %p730_p2 = scmp.ne.s32.totalorder %s729_s5, 0 }
  0x3c   : > { %s190_s26 = sand.u32 (!%p730_p2), 1, %s566_s10   ;;  %p731_p10 = scmp.ne.s32.totalorder (!%p730_p2), %s727_s16, 0 }
  0x3d   : > { %188 = sbr.rel (%p730_p2) target bundleno = 293 (0x125), region = 28  ;;  %s394_s27 = sshll.u32 (!%p730_p2), %s190_s26, 4 }
  0x3e   : > { %s191_s28 = scalar_lea.sflag (!%p730_p2), [#allocation4], %s190_s26  ;;  %s194_s3 = scalar_lea.vmem (!%p730_p2), [#allocation3], %s394_s27 }
  0x44   : > { %552 = dma.done.wait (%p731_p10), %s191_s28, 256  }
  0x45   : > { %554 = vsyncadd (%p731_p10), %s191_s28, 4294967040  ;;  %s200_s19 = scalar_lea.sflag [#allocation6], %s190_s26  ;;  %s203_s4 = scalar_lea.vmem [#allocation5], %s394_s27 }
  0x46   : > { %556 = dma.done.wait (%p731_p10), %s200_s19, 256  }
  0x47   : > { %558 = vsyncadd (%p731_p10), %s200_s19, 4294967040  ;;  %s398_s29 = sshll.u32 %s570_s11, 11  ;;  %v257_v0 = vlaneseq  ;;  %v243_v8 = vld [vmem:[%s194_s3] sm:$0xff]  ;;  %v244_v9 = vld [vmem:[%s194_s3 + $0x8] sm:$0xff]  ;;  %p235_p8 = scmp.lt.s32.totalorder %s570_s11, 1  ;;  %vm291_vm2 = vcmask 0  }
  0x48   : > { %v264_v2 = vstv %s398_s29  ;;  %v245_v10 = vld [vmem:[%s203_s4] sm:$0xff]  ;;  %v246_v11 = vld [vmem:[%s203_s4 + $0x8] sm:$0xff] }
  0x49   : > { %v258_v1 = vshrl.u32 %v257_v0, 7  ;;  %v261_v5 = vand.u32 127, %v257_v0  ;;  %v247_v12 = vsub.f32 %v243_v8, %v245_v10  ;;  %v248_v14 = vsub.f32 %v244_v9, %v246_v11  ;;  %s738_s11 = smov (!%p235_p8, %s570_s11), 1 }
  0x4a   : > { %s237_s5 = scalar_lea.vmem %s725_s2, %s738_s11 }
  0x4b   : > { %v259_v3 = vadd.s32 8, %v258_v1  ;;  %v262_v4 = vmul.u32 128, %v258_v1  ;;  %v249_v16 = vand.u32 2147483647, %v247_v12  ;;  %v250_v18 = vand.u32 2147483647, %v248_v14 }
  0x4d   : > { %v263_v6 = vmul.u32 128, %v259_v3  ;;  %v265_v7 = vadd.s32 %v264_v2, %v262_v4  ;;  %v396_v19 = vadd.f32 -0.094, %v249_v16  ;;  %v397_v20 = vadd.f32 -0.094, %v250_v18 }
  0x4f   : > { %v266_v13 = vadd.s32 %v264_v2, %v263_v6  ;;  %v267_v15 = vadd.s32 %v265_v7, %v261_v5  ;;  %v253_v21 = vmax.f32 %v396_v19, 0.0  ;;  %v254_v22 = vmax.f32 %v397_v20, 0.0 }
  0x51   : > { %v268_v17 = vadd.s32 %v266_v13, %v261_v5  ;;  %vm269_vm0 = vcmp.lt.s32.totalorder %v267_v15, 2048 }
  0x52   : > { %v271_v23 = vsel %vm269_vm0, %v253_v21, 0.0 }
  0x53   : > { %vm270_vm1 = vcmp.lt.s32.totalorder %v268_v17, 2048 }
  0x54   : > { %v272_v24 = vsel %vm270_vm1, %v254_v22, 0.0 }
  0x55   : > { %v274_v25 = vadd.f32 %v272_v24, %v271_v23 }
  0x57   : > { %281 = vadd.xlane.f32.xlu0 %v274_v25 }
  0xe4   : > { %v282_v26 = vpop.xlane.xlu0 %281 }
  0xe5   : > { %v283_v27 = vrot.slane %v282_v26, 4 }
  0xe7   : > { %v284_v28 = vadd.f32 %v283_v27, %v282_v26 }
  0xe9   : > { %v285_v29 = vrot.slane %v284_v28, 2 }
  0xeb   : > { %v286_v30 = vadd.f32 %v285_v29, %v284_v28 }
  0xed   : > { %v287_v31 = vrot.slane %v286_v30, 1 }
  0xef   : > { %v288_v32 = vadd.f32 %v287_v31, %v286_v30 }
  0xf1   : > { %403 = vpush %v288_v32 }
 0x122   : > { %s404_s6 = spop %403 }
 0x123   : > { %v290_v33 = vstv %s404_s6 }
 0x124   : > { %292 = vst.msk [vmem:[%s237_s5] sm:$0x1] %vm291_vm2, %v290_v33 }
 0x125 PF: > { %s18_s13 = sadd.s32 1, %s578_s13   ;;  %s732_s9 = smov %s566_s10 }
 0x126   : > { %p15_p0 = scmp.ge.s32.totalorder %s18_s13, 4   ;;  %s713_s10 = smov 0  }
 0x127   : > { %s733_s11 = smov %s574_s12  ;;  %s734_s12 = smov %s736_s15 }
 0x128   :  { %17 = sbr.rel (!%p15_p0) target bundleno = 6 (0x6), region = 89 }
 0x12f   :  { %310 = vsyncpa [#allocation4], 1 }
 0x130   :  { %312 = vsyncpa [#allocation4 + $0x1], 1 }
 0x131   :  { %313 = vsyncpa [#allocation6], 1 }
 0x132   :  { %315 = vsyncpa [#allocation6 + $0x1], 1 }

</bundles_post_ra>
